<compile_context>
chip_gen: v7x
topology: tpu7x:2x2x1
jax: 0.10.0
libtpu: 0.0.40
codegen_flags: <defaults>
</compile_context>

<pallas_src>
import functools

import jax
import jax.numpy as jnp
from jax.experimental import pallas as pl
from jax.experimental.pallas import tpu as pltpu


def _round_up(x, m):
    return (x + m - 1) // m * m


def _pad_dim(d):
    # Lane/MXU alignment for internal (non-HBM-streamed) dims: 128 for small
    # dims; for dims > 128 round to 256 so the 2x256^2 MXU on v6e/v7x is fully
    # fed (harmless on v5e: these weights are VMEM-resident and tiny vs. x/out).
    return _round_up(d, 128) if d <= 128 else _round_up(d, 256)


@functools.lru_cache(maxsize=None)
def _vmem_budget_cap_bytes():
    try:
        cap = int(pltpu.get_tpu_info().vmem_capacity_bytes)
    except Exception:
        cap = 64 * 1024 * 1024  # conservative fallback: v7x per-core VMEM
    # ~75% of physical VMEM, never above 100 MiB: ~96 MiB on v5e/v6e, ~48 MiB on v7x.
    return min(cap * 3 // 4, 100 * 1024 * 1024)


def _finetune_kernel(x_ref, w_emb_ref, b_emb_ref, w_cls_ref, b_cls_ref, out_ref):
    # --- embedding_model.encode: dense projection + tanh -------------------
    # Cast x to the MXU dtype in-kernel (VPU, free in a memory-bound kernel;
    # avoids a separate pad/cast pass over HBM).  MXU accumulates in f32.
    x = x_ref[...].astype(w_emb_ref.dtype)                       # (TB, F) bf16
    emb = jnp.dot(x, w_emb_ref[...],
                  preferred_element_type=jnp.float32)            # (TB, E_pad) f32
    emb = jnp.tanh(emb + b_emb_ref[...])                         # f32 (v5e-safe)

    # --- xgboost_wrapper surrogate: linear + softmax ------------------------
    logits = jnp.dot(emb.astype(w_cls_ref.dtype), w_cls_ref[...],
                     preferred_element_type=jnp.float32)         # (TB, T_pad) f32
    # Padded topic lanes carry a -1e30 bias: they exp() to exactly 0.  Logits
    # and softmax must stay f32 for this sentinel to be valid.
    logits = logits + b_cls_ref[...]

    # Numerically stable softmax over the lane-dense topic axis (exact
    # normalization: EUP/VPU have plenty of slack at these shapes).
    m = jnp.max(logits, axis=-1, keepdims=True)
    e = jnp.exp(logits - m)
    probs = e / jnp.sum(e, axis=-1, keepdims=True)
    out_ref[...] = probs.astype(out_ref.dtype)


@functools.partial(jax.jit,
                   static_argnames=("num_topics", "block_batch", "out_dtype"))
def finetuning_forward(x, w_emb_p, b_emb_p, w_cls_p, b_cls_p, *,
                       num_topics, block_batch=512, out_dtype=jnp.bfloat16):
    """Fused forward: softmax(tanh(x @ W_emb + b_emb) @ W_cls + b_cls)."""
    batch, in_features = x.shape
    assert w_emb_p.shape[0] == in_features
    e_pad = w_emb_p.shape[1]
    t_pad = w_cls_p.shape[1]

    # Batch tile: large (up to block_batch rows), 16-row aligned (bf16 sublane
    # packing).  Cap the tile so that large batches always yield >= 2 grid
    # steps, letting the "parallel" axis shard across v7x's two TensorCores.
    b16 = _round_up(batch, 16)
    tb = min(block_batch, b16)
    if b16 >= 32:
        tb = min(tb, _round_up(pl.cdiv(b16, 2), 16))
    tb = max(tb, 16)
    b_pad = _round_up(batch, tb)

    # Only the batch axis is (maybe) padded; the feature axis stays unpadded so
    # x's HBM traffic is never inflated and no extra pad/cast kernel runs when
    # batch is already tile-aligned.
    x_in = x if b_pad == batch else jnp.pad(x, ((0, b_pad - batch), (0, 0)))

    grid = (b_pad // tb,)

    x_bytes = jnp.dtype(x.dtype).itemsize
    w_bytes = jnp.dtype(w_emb_p.dtype).itemsize
    out_bytes = jnp.dtype(out_dtype).itemsize

    flops = 2 * b_pad * (in_features * e_pad + e_pad * t_pad)
    transcendentals = b_pad * (e_pad + t_pad)                      # tanh + exp
    bytes_accessed = (b_pad * in_features * x_bytes                # x
                      + (in_features * e_pad + e_pad * t_pad) * w_bytes  # weights
                      + (e_pad + t_pad) * 4                        # biases
                      + b_pad * t_pad * out_bytes)                 # out

    # Double-buffered x/out tiles + resident weights/biases (+ headroom),
    # capped by the per-generation VMEM budget.
    working_set = (2 * tb * (in_features * x_bytes + t_pad * out_bytes)
                   + (in_features * e_pad + e_pad * t_pad) * w_bytes
                   + (e_pad + t_pad) * 4)
    vmem_limit = int(min(_vmem_budget_cap_bytes(),
                         max(1 << 20, 4 * working_set)))

    out_padded = pl.pallas_call(
        _finetune_kernel,
        out_shape=jax.ShapeDtypeStruct((b_pad, t_pad), out_dtype),
        grid_spec=pl.GridSpec(
            grid=grid,
            in_specs=[
                pl.BlockSpec((tb, in_features), lambda i: (i, 0)),    # batch-tiled x
                pl.BlockSpec((in_features, e_pad), lambda i: (0, 0)),  # resident weights
                pl.BlockSpec((1, e_pad), lambda i: (0, 0)),
                pl.BlockSpec((e_pad, t_pad), lambda i: (0, 0)),
                pl.BlockSpec((1, t_pad), lambda i: (0, 0)),
            ],
            out_specs=pl.BlockSpec((tb, t_pad), lambda i: (i, 0)),
        ),
        compiler_params=pltpu.CompilerParams(
            dimension_semantics=("parallel",),
            vmem_limit_bytes=vmem_limit,
        ),
        cost_estimate=pl.CostEstimate(
            flops=flops,
            transcendentals=transcendentals,
            bytes_accessed=bytes_accessed,
        ),
    )(x_in, w_emb_p, b_emb_p, w_cls_p, b_cls_p)

    # Strip padding back to the logical (batch, num_topics) result.
    return out_padded[:batch, :num_topics]


class FineTuningModel:
    """JAX/Pallas analogue of the PyTorch FineTuningModel.

    Parameter padding + bf16 casts are done ONCE here (hoisted out of the
    per-call forward); forward(input_data) mirrors the PyTorch module and uses
    input_data[0].
    """

    def __init__(self, w_emb, b_emb, w_cls, b_cls, *,
                 mxu_dtype=jnp.bfloat16, out_dtype=jnp.bfloat16,
                 block_batch=512):
        in_features, emb_dim = w_emb.shape
        emb_dim2, num_topics = w_cls.shape
        assert emb_dim == emb_dim2
        self.num_topics = int(num_topics)
        self.out_dtype = out_dtype
        self.block_batch = int(block_batch)

        e_pad = _pad_dim(emb_dim)
        t_pad = _round_up(num_topics, 128)   # lane-dense output, minimal padding
        neg = jnp.float32(-1e30)             # padded topic lanes -> probability 0

        self.w_emb_p = (jnp.zeros((in_features, e_pad), mxu_dtype)
                        .at[:, :emb_dim].set(jnp.asarray(w_emb).astype(mxu_dtype)))
        self.b_emb_p = (jnp.zeros((1, e_pad), jnp.float32)
                        .at[:, :emb_dim].set(jnp.asarray(b_emb, jnp.float32).reshape(1, -1)))
        self.w_cls_p = (jnp.zeros((e_pad, t_pad), mxu_dtype)
                        .at[:emb_dim, :num_topics].set(jnp.asarray(w_cls).astype(mxu_dtype)))
        self.b_cls_p = (jnp.full((1, t_pad), neg, jnp.float32)
                        .at[:, :num_topics].set(jnp.asarray(b_cls, jnp.float32).reshape(1, -1)))

    def __call__(self, input_data):
        return finetuning_forward(
            input_data[0], self.w_emb_p, self.b_emb_p, self.w_cls_p, self.b_cls_p,
            num_topics=self.num_topics, block_batch=self.block_batch,
            out_dtype=self.out_dtype)


def _reference_forward(x, w_emb, b_emb, w_cls, b_cls):
    emb = jnp.tanh(x @ w_emb + b_emb)
    logits = emb @ w_cls + b_cls
    return jax.nn.softmax(logits, axis=-1)


if __name__ == "__main__":
    # Small, deterministic shapes consistent with the forward pass.
    batch, in_features, emb_dim, num_topics = 8, 32, 64, 16

    key = jax.random.PRNGKey(0)
    k_x, k_we, k_be, k_wc, k_bc = jax.random.split(key, 5)

    # input_data is a tuple in the original module; forward uses input_data[0].
    input_data = (
        jax.random.normal(k_x, (batch, in_features), dtype=jnp.float32),
    )

    # Deterministic synthetic parameters (embedding encoder + topic head).
    w_emb = jax.random.normal(k_we, (in_features, emb_dim), jnp.float32) * 0.1
    b_emb = jax.random.normal(k_be, (1, emb_dim), jnp.float32) * 0.01
    w_cls = jax.random.normal(k_wc, (emb_dim, num_topics), jnp.float32) * 0.1
    b_cls = jax.random.normal(k_bc, (1, num_topics), jnp.float32) * 0.01

    model = FineTuningModel(w_emb, b_emb, w_cls, b_cls)
    out = jax.block_until_ready(model(input_data))

    ref = _reference_forward(input_data[0], w_emb, b_emb, w_cls, b_cls)
    out_f32 = out.astype(jnp.float32)
    assert out.shape == (batch, num_topics)
    assert out.dtype == jnp.bfloat16          # bf16 output stream (memory-bound win)
    # bf16 MXU inputs + bf16 output rounding -> relaxed (but tight for probs) tolerance.
    assert jnp.allclose(out_f32, ref, atol=2e-2, rtol=2e-2)
    assert jnp.allclose(jnp.sum(out_f32, axis=-1), 1.0, atol=2e-2)

    # TODO(synk): the real xgboost_wrapper is a tree ensemble (non-differentiable)
    # and embedding_model.encode is an opaque sentence encoder; both are
    # represented by their standard differentiable dense surrogates here.
    print("KERNEL_OK")
</pallas_src>

<mosaic_0001>
module attributes {stable_mosaic.version = 11 : i64} {
  func.func @_finetune_kernel(%arg0: i32, %arg1: memref<16x32xf32, #tpu.memory_space<vmem>>, %arg2: memref<32x128xbf16, #tpu.memory_space<vmem>>, %arg3: memref<1x128xf32, #tpu.memory_space<vmem>>, %arg4: memref<128x128xbf16, #tpu.memory_space<vmem>>, %arg5: memref<1x128xf32, #tpu.memory_space<vmem>>, %arg6: memref<16x128xbf16, #tpu.memory_space<vmem>>) attributes {dimension_semantics = [#tpu.dimension_semantics<parallel>], iteration_bounds = array<i64: 1>, scalar_prefetch = 0 : i64, scratch_operands = 0 : i64, tpu.core_type = #tpu.core_type<tc>, window_params = [{transform_indices = @transform_0, window_bounds = array<i64: 16, 32>}, {pipeline_mode = #tpu.pipeline_mode<synchronous>, transform_indices = @transform_1, window_bounds = array<i64: 32, 128>}, {pipeline_mode = #tpu.pipeline_mode<synchronous>, transform_indices = @transform_2, window_bounds = array<i64: 1, 128>}, {pipeline_mode = #tpu.pipeline_mode<synchronous>, transform_indices = @transform_3, window_bounds = array<i64: 128, 128>}, {pipeline_mode = #tpu.pipeline_mode<synchronous>, transform_indices = @transform_4, window_bounds = array<i64: 1, 128>}, {transform_indices = @transform_5, window_bounds = array<i64: 16, 128>}]} {
    %c0 = arith.constant 0 : index
    %c0_0 = arith.constant 0 : index
    %0 = vector.load %arg1[%c0, %c0_0] : memref<16x32xf32, #tpu.memory_space<vmem>>, vector<16x32xf32>
    %1 = arith.truncf %0 : vector<16x32xf32> to vector<16x32xbf16>
    %c0_1 = arith.constant 0 : index
    %c0_2 = arith.constant 0 : index
    %2 = vector.load %arg2[%c0_1, %c0_2] : memref<32x128xbf16, #tpu.memory_space<vmem>>, vector<32x128xbf16>
    %cst = arith.constant dense<0.000000e+00> : vector<16x128xf32>
    %3 = tpu.matmul %1, %2, %cst {dimension_numbers = #tpu.dot_dimension_numbers<[1], [0], [0], [1], [0, 0, 1, 1], [], []>} : vector<16x32xbf16>, vector<32x128xbf16>, vector<16x128xf32> -> vector<16x128xf32>
    %c0_3 = arith.constant 0 : index
    %c0_4 = arith.constant 0 : index
    %4 = vector.load %arg3[%c0_3, %c0_4] : memref<1x128xf32, #tpu.memory_space<vmem>>, vector<1x128xf32>
    %5 = vector.broadcast %4 : vector<1x128xf32> to vector<16x128xf32>
    %6 = arith.addf %3, %5 : vector<16x128xf32>
    %7 = math.tanh %6 : vector<16x128xf32>
    %8 = arith.truncf %7 : vector<16x128xf32> to vector<16x128xbf16>
    %c0_5 = arith.constant 0 : index
    %c0_6 = arith.constant 0 : index
    %9 = vector.load %arg4[%c0_5, %c0_6] : memref<128x128xbf16, #tpu.memory_space<vmem>>, vector<128x128xbf16>
    %cst_7 = arith.constant dense<0.000000e+00> : vector<16x128xf32>
    %10 = tpu.matmul %8, %9, %cst_7 {dimension_numbers = #tpu.dot_dimension_numbers<[1], [0], [0], [1], [0, 0, 1, 1], [], []>} : vector<16x128xbf16>, vector<128x128xbf16>, vector<16x128xf32> -> vector<16x128xf32>
    %c0_8 = arith.constant 0 : index
    %c0_9 = arith.constant 0 : index
    %11 = vector.load %arg5[%c0_8, %c0_9] : memref<1x128xf32, #tpu.memory_space<vmem>>, vector<1x128xf32>
    %12 = vector.broadcast %11 : vector<1x128xf32> to vector<16x128xf32>
    %13 = arith.addf %10, %12 : vector<16x128xf32>
    %cst_10 = arith.constant dense<0xFF800000> : vector<16xf32>
    %14 = vector.multi_reduction <maximumf>, %13, %cst_10 [1] : vector<16x128xf32> to vector<16xf32>
    %15 = vector.shape_cast %14 : vector<16xf32> to vector<16x1xf32>
    %16 = vector.broadcast %15 : vector<16x1xf32> to vector<16x128xf32>
    %17 = arith.subf %13, %16 : vector<16x128xf32>
    %18 = math.exp %17 : vector<16x128xf32>
    %cst_11 = arith.constant dense<0.000000e+00> : vector<16xf32>
    %19 = vector.multi_reduction <add>, %18, %cst_11 [1] : vector<16x128xf32> to vector<16xf32>
    %20 = vector.shape_cast %19 : vector<16xf32> to vector<16x1xf32>
    %21 = vector.broadcast %20 : vector<16x1xf32> to vector<16x128xf32>
    %22 = arith.divf %18, %21 : vector<16x128xf32>
    %23 = arith.truncf %22 : vector<16x128xf32> to vector<16x128xbf16>
    %c0_12 = arith.constant 0 : index
    %c0_13 = arith.constant 0 : index
    %24 = vector.load %arg6[%c0_12, %c0_13] : memref<16x128xbf16, #tpu.memory_space<vmem>>, vector<16x128xbf16>
    tpu.vector_store %arg6[%c0_12, %c0_13], %23 {strides = array<i32>} : memref<16x128xbf16, #tpu.memory_space<vmem>>, vector<16x128xbf16>,
    return
  }
  func.func @transform_0(%arg0: i32) -> (i32, i32) {
    %c0_i32 = arith.constant 0 : i32
    %c0_i32_0 = arith.constant 0 : i32
    return %arg0, %c0_i32 : i32, i32
  }
  func.func @transform_1(%arg0: i32) -> (i32, i32) {
    %c0_i32 = arith.constant 0 : i32
    %c0_i32_0 = arith.constant 0 : i32
    %c0_i32_1 = arith.constant 0 : i32
    return %c0_i32, %c0_i32_0 : i32, i32
  }
  func.func @transform_2(%arg0: i32) -> (i32, i32) {
    %c0_i32 = arith.constant 0 : i32
    %c0_i32_0 = arith.constant 0 : i32
    %c0_i32_1 = arith.constant 0 : i32
    return %c0_i32, %c0_i32_0 : i32, i32
  }
  func.func @transform_3(%arg0: i32) -> (i32, i32) {
    %c0_i32 = arith.constant 0 : i32
    %c0_i32_0 = arith.constant 0 : i32
    %c0_i32_1 = arith.constant 0 : i32
    return %c0_i32, %c0_i32_0 : i32, i32
  }
  func.func @transform_4(%arg0: i32) -> (i32, i32) {
    %c0_i32 = arith.constant 0 : i32
    %c0_i32_0 = arith.constant 0 : i32
    %c0_i32_1 = arith.constant 0 : i32
    return %c0_i32, %c0_i32_0 : i32, i32
  }
  func.func @transform_5(%arg0: i32) -> (i32, i32) {
    %c0_i32 = arith.constant 0 : i32
    %c0_i32_0 = arith.constant 0 : i32
    return %arg0, %c0_i32 : i32, i32
  }
}

</mosaic_0001>

<bundles_post_ra>
// kernel: finetuning_forward.1
= control target key start
LH: loop header
LB: loop body
LE: loop exit
PB: predicated region body
PF: predicated region fallthrough
CT: control target
= control target key end

     0   :  { %10 = vsyncpa [#allocation3], 0  ;;  %s367_s18 = smov [#allocation2]   ;;  %s435_s0 = inlined_call_operand.vmem [shape: f32[16,32], index: 0, kind: input, shape index: {}]   ;;  %s436_s1 = inlined_call_operand.vmem [shape: bf16[32,128], index: 1, kind: input, shape index: {}]   ;;  %s437_s2 = inlined_call_operand.vmem [shape: f32[1,128], index: 2, kind: input, shape index: {}]   ;;  %s438_s3 = inlined_call_operand.hbm [shape: bf16[128,128], index: 3, kind: input, shape index: {}]   ;;  %s439_s4 = inlined_call_operand.vmem [shape: f32[1,128], index: 4, kind: input, shape index: {}]   ;;  %s440_s5 = inlined_call_operand.vmem [shape: bf16[16,128], index: 5, kind: output, shape index: {}]  }
   0x1   :  { %s22_s19 = sshll.u32 %s367_s18, 4  ;;  %s343_s22 = scalar_lea.hbm %s438_s3, 1024  ;;  %s23_s19 = int_to_ptr.vmem [resolvable:$true] %s22_s19 }
   0x2   :  { %p344_p0 = scmp.ne.s32.totalorder %s438_s3, %s343_s22  ;;  %p347_p1 = scmp.lt.u32.totalorder %s343_s22, %s438_s3 }
   0x4   :  { %p349_p2 = pnand %p347_p1, %p344_p0 }
   0x6   :  { %352 = shalt.err (!%p349_p2)
}
   0x7   :  { %s353_s27 = scalar_lea.vmem %s23_s19, 1024  ;;  %p358_p4 = scmp.lt.s32.totalorder %s23_s19, %s23_s19 }
   0x8   :  { %p354_p3 = scmp.ne.s32.totalorder %s23_s19, %s353_s27  ;;  %p359_p5 = scmp.lt.s32.totalorder %s353_s27, %s353_s27 }
   0xa   :  { %p360_p6 = por %p359_p5, %p358_p4 }
   0xc   :  { %p361_p7 = pnand %p360_p6, %p354_p3 }
   0xe   :  { %364 = shalt.err (!%p361_p7)
}
   0xf   :  { %s368_s28 = smov 64   ;;  %s369_s29 = smov 4  }
  0x10   :  { %28 = dma.hbm_to_vmem [thread:$0]  %s438_s3, 1024, %s23_s19, [#allocation3], %s368_s28, %s368_s28, %s369_s29  }
  0x11   :  { %365 = dma.done.wait [#allocation3], 1024  }
  0x12   :  { %366 = vsyncadd [#allocation3], 4294966272  ;;  %v370_v0 = vmov 0.0   ;;  %vm371_vm0 = vmmov 0   ;;  %v321_v1 = vld [vmem:[%s436_s1] sm:$0xff]   ;;  %v322_v2 = vld [vmem:[%s436_s1 + $0x8] sm:$0xff]  }
  0x13   :  { %288 = vmatprep.subr.bf16.mxu0 %v370_v0  ;;  %292 = vmatprep.mubr.msk.bf16.mxu0 %vm371_vm0, %v370_v0  ;;  %v35_v3 = vld [vmem:[%s435_s0] sm:$0xff]  ;;  %v36_v4 = vld [vmem:[%s435_s0 + $0x8] sm:$0xff]  ;;  %v323_v5 = vld [vmem:[#allocation2] sm:$0xff]   ;;  %vm61_vm1 = vcmask 261120  }
  0x14   :  { %296 = vmatprep.subr.bf16.mxu1 %v370_v0  ;;  %312 = vmatprep.mubr.msk.bf16.mxu1 %vm371_vm0, %v370_v0  ;;  %v37_v6 = vpack.c.bf16 %v36_v4, %v35_v3  ;;  %v324_v7 = vld [vmem:[#allocation2 + $0x8] sm:$0xff]   ;;  %v325_v8 = vld [vmem:[#allocation2 + $0x10] sm:$0xff]   ;;  %v326_v9 = vld [vmem:[#allocation2 + $0x18] sm:$0xff]  }
  0x15   :  { %289 = vmatpush3.bf16.msra.mxu0 %v321_v1  ;;  %297 = vmatpush3.bf16.msra.mxu1 %v323_v5  ;;  %v327_v10 = vld [vmem:[#allocation2 + $0x20] sm:$0xff]   ;;  %v328_v11 = vld [vmem:[#allocation2 + $0x28] sm:$0xff]   ;;  %v329_v12 = vld [vmem:[#allocation2 + $0x30] sm:$0xff]  }
  0x16   :  { %290 = vmatprep.subr.bf16.mxu0 %v370_v0  ;;  %298 = vmatprep.subr.bf16.mxu1 %v370_v0  ;;  %v330_v13 = vld [vmem:[#allocation2 + $0x38] sm:$0xff]   ;;  %v254_v14 = vld [vmem:[%s437_s2] ss:$0 sm:$0xff] }
  0x17   :  { %v258_v24 = vld [vmem:[%s439_s4] ss:$0 sm:$0xff] }
  0x19   :  { %291 = vmatpush3.bf16.msra.mxu0 %v322_v2  ;;  %299 = vmatpush3.bf16.msra.mxu1 %v324_v7 }
  0x1a   :  { %300 = vmatprep.subr.bf16.mxu1 %v370_v0 }
  0x1c   :  { %293 = vmatmul.mubr.msk.bf16.vlgmr.msra.gmra.mrb[0].mxu0 %vm61_vm1, %v37_v6 }
  0x1d   :  { %301 = vmatpush3.bf16.msra.mxu1 %v325_v8 }
  0x1e   :  { %302 = vmatprep.subr.bf16.mxu1 %v370_v0 }
  0x21   :  { %303 = vmatpush3.bf16.msra.mxu1 %v326_v9 }
  0x22   :  { %304 = vmatprep.subr.bf16.mxu1 %v370_v0 }
  0x25   :  { %305 = vmatpush3.bf16.msra.mxu1 %v327_v10 }
  0x26   :  { %306 = vmatprep.subr.bf16.mxu1 %v370_v0 }
  0x29   :  { %307 = vmatpush3.bf16.msra.mxu1 %v328_v11 }
  0x2a   :  { %308 = vmatprep.subr.bf16.mxu1 %v370_v0 }
  0x2d   :  { %309 = vmatpush3.bf16.msra.mxu1 %v329_v12 }
  0x2e   :  { %310 = vmatprep.subr.bf16.mxu1 %v370_v0 }
  0x31   :  { %311 = vmatpush3.bf16.msra.mxu1 %v330_v13 }
  0xef   :  { %v99_v15 = vpop.f32.mrb[0].mxu0 }
  0xf0   :  { %v100_v16 = vadd.f32 %v254_v14, %v99_v15  ;;  %v294_v17 = vpop.f32.mrb[1].mxu0 }
  0xf1   :  { %v102_v18 = vpop.f32.mrb[2].mxu0 }
  0xf2   :  { %v103_v19 = vadd.f32 %v254_v14, %v102_v18  ;;  %v295_v20 = vpop.f32.mrb[3].mxu0  ;;  %331 = vtanh.f32 %v100_v16 }
  0xf4   :  { %333 = vtanh.f32 %v103_v19 }
  0xfc   :  { %v332_v21 = vpop.eup %331 }
  0xfe   :  { %v334_v22 = vpop.eup %333 }
  0xff   :  { %v108_v23 = vpack.c.bf16 %v334_v22, %v332_v21 }
 0x101   :  { %313 = vmatmul.mubr.bf16.vlgmr.msra.gmra.mrb[0].mxu1 %v108_v23 }
 0x1d4   :  { %v214_v25 = vpop.f32.mrb[0].mxu1 }
 0x1d5   :  { %v215_v26 = vadd.f32 %v258_v24, %v214_v25  ;;  %v314_v27 = vpop.f32.mrb[1].mxu1 }
 0x1d6   :  { %v217_v28 = vpop.f32.mrb[2].mxu1 }
 0x1d7   :  { %221 = vmax.xlane.f32.xlu0 %v215_v26  ;;  %v315_v29 = vpop.f32.mrb[3].mxu1  ;;  %v218_v30 = vadd.f32 %v258_v24, %v217_v28 }
 0x1db   :  { %223 = vmax.xlane.f32.xlu0 %v218_v30 }
 0x264   :  { %v222_v31 = vpop.xlane.xlu0 %221 }
 0x265   :  { %v225_v32 = vsub.f32 %v215_v26, %v222_v31 }
 0x267   :  { %v227_v33 = vmul.f32 1.442695, %v225_v32 }
 0x268   :  { %v224_v34 = vpop.xlane.xlu0 %223 }
 0x269   :  { %335 = vpow2.f32 %v227_v33  ;;  %v226_v35 = vsub.f32 %v218_v30, %v224_v34 }
 0x26b   :  { %v229_v36 = vmul.f32 1.442695, %v226_v35 }
 0x26d   :  { %337 = vpow2.f32 %v229_v36 }
 0x273   :  { %v336_v37 = vpop.eup %335 }
 0x274   :  { %231 = vadd.xlane.f32.xlu1 %v336_v37 }
 0x277   :  { %v338_v38 = vpop.eup %337 }
 0x278   :  { %233 = vadd.xlane.f32.xlu1 %v338_v38 }
 0x301   :  { %v232_v39 = vpop.xlane.xlu1 %231 }
 0x302   :  { %339 = vrcp.f32 %v232_v39 }
 0x305   :  { %v234_v40 = vpop.xlane.xlu1 %233 }
 0x306   :  { %341 = vrcp.f32 %v234_v40 }
 0x30c   :  { %v340_v41 = vpop.eup %339 }
 0x30d   :  { %v236_v43 = vmul.f32 %v340_v41, %v336_v37 }
 0x310   :  { %v342_v42 = vpop.eup %341 }
 0x311   :  { %v238_v44 = vmul.f32 %v342_v42, %v338_v38 }
 0x313   :  { %v274_v45 = vpack.c.bf16 %v238_v44, %v236_v43 }
 0x315   :  { %275 = vst [vmem:[%s440_s5] sm:$0xff] %v274_v45  }
 0x316   :  { %253 = vsyncpa [#allocation3], 1 }

</bundles_post_ra>
